<compile_context>
chip_gen: v5e
topology: v5e:2x2
jax: 0.10.0
libtpu: 0.0.40
codegen_flags: <defaults>
</compile_context>

<pallas_src>
import functools

import jax
import jax.numpy as jnp
from jax import lax
from jax.experimental import pallas as pl
from jax.experimental.pallas import tpu as pltpu


def _round_up(x: int, m: int) -> int:
    return ((x + m - 1) // m) * m


def _vmem_capacity_bytes(default: int = 64 * 1024 * 1024) -> int:
    """Physical VMEM of the attached TPU; conservative (v7x) default."""
    try:
        info = pltpu.get_tpu_info()
        cap = getattr(info, "vmem_capacity_bytes", None)
        if cap:
            return int(cap)
    except Exception:
        pass
    return default


def _gaussian_kernel(x_ref, mean_ref, cov_ref, *, n_batch: int):
    # x_ref:    (T_P, B, C)      observations for T_P patches (original dtype)
    # mean_ref: (T_P, C)         per-channel means
    # cov_ref:  (T_P, C, C)      regularized unbiased covariances
    xf = x_ref[...].astype(jnp.float32)              # cast per tile (input may be bf16)

    inv_b = jnp.float32(1.0 / n_batch)
    mean2d = jnp.sum(xf, axis=1) * inv_b             # (T_P, C)
    mean_ref[...] = mean2d                           # one dense full-block store

    # Centered observations (padded patch rows are all-zero -> stay zero).
    xm = xf - mean2d[:, None, :]                     # (T_P, B, C)

    # Batched Gram on the MXU: cov[p] = xm[p]^T @ xm[p] / (B - 1)
    cov = jnp.einsum(
        "pbc,pbd->pcd", xm, xm, preferred_element_type=jnp.float32,
    ) * jnp.float32(1.0 / (n_batch - 1))

    # + 0.01 * I via a single 2-D diag constant broadcast over the patch dim
    # (no 3-D iotas, no full-tile select).
    c = cov.shape[-1]
    row = lax.broadcasted_iota(jnp.int32, (c, c), 0)
    col = lax.broadcasted_iota(jnp.int32, (c, c), 1)
    diag = jnp.where(row == col, jnp.float32(0.01), jnp.float32(0.0))
    cov_ref[...] = cov + diag[None]


def _per_patch_vmem_bytes(n_batch: int, channel: int, itemsize: int) -> int:
    """Per-patch VMEM footprint, using VMEM-padded (sublane 8 / lane 128)
    extents and including in-kernel temporaries, not just BlockSpec tiles."""
    c_lane = _round_up(channel, 128)
    c_sub = _round_up(channel, 8)
    return (
        2 * n_batch * c_lane * itemsize          # double-buffered input tile
        + 2 * (c_lane + c_sub * c_lane) * 4      # double-buffered mean + cov outputs
        + 2 * n_batch * c_lane * 4               # xf + xm f32 temporaries
        + (c_sub * c_lane + c_lane) * 4          # cov result pre-store + mean2d
    )


def _choose_patch_tile(n_patches: int, n_batch: int, channel: int, itemsize: int,
                       vmem_budget_bytes: int) -> tuple[int, int]:
    """Patches per grid step: large enough to amortize the ~0.35us/step grid
    overhead and produce big DMAs, small enough to fit the per-generation VMEM
    budget, while keeping >= 4 grid steps (>= 2 per TensorCore on v7x) when
    the patch count allows it so double-buffering overlaps DMA with compute."""
    per_patch = _per_patch_vmem_bytes(n_batch, channel, itemsize)
    tp = vmem_budget_bytes // max(per_patch, 1)
    tp = max(8, min(128, int(tp)))
    tp -= tp % 8

    p8 = _round_up(n_patches, 8)
    min_steps = 4                                   # 2 steps per core on v7x megacore
    max_steps_possible = p8 // 8
    target_steps = min(min_steps, max_steps_possible)
    if target_steps > 1:
        tp_cap = max(8, ((p8 // target_steps) // 8) * 8)
        tp = min(tp, tp_cap)
    tp = min(tp, p8)
    return tp, per_patch


class MultiVariateGaussian:
    """JAX/Pallas port of the PyTorch MultiVariateGaussian module."""

    def __init__(self, n_features: int, n_patches: int):
        self.mean = jnp.zeros((n_features, n_patches), dtype=jnp.float32)
        self.inv_covariance = jnp.tile(
            jnp.eye(n_features, dtype=jnp.float32)[None], (n_patches, 1, 1)
        )

    def forward(self, embedding: jax.Array):
        # embedding: (patch, batch, channel) -- matches the PyTorch forward.
        patch, batch, channel = embedding.shape
        if batch < 2:
            raise ValueError("unbiased covariance requires batch >= 2")

        itemsize = jnp.dtype(embedding.dtype).itemsize

        # Per-generation VMEM sizing: ~40% of physical VMEM for the pipelined
        # tiles/temps (so 128 MiB chips tile bigger than 64 MiB v7x).
        vmem_cap = _vmem_capacity_bytes()
        tile_budget = max(8 << 20, int(vmem_cap * 0.40))
        tp, per_patch_bytes = _choose_patch_tile(patch, batch, channel, itemsize,
                                                 tile_budget)
        p_pad = _round_up(patch, tp)

        # Only the patch axis is padded; batch/channel blocks use full extents
        # (legal even when not (8,128)-multiples), so no padded HBM copy of
        # the whole embedding and no padded covariance writeback.
        emb = embedding
        if p_pad != patch:
            emb = jnp.pad(embedding, ((0, p_pad - patch), (0, 0), (0, 0)))

        grid = (p_pad // tp,)
        c_lane = _round_up(channel, 128)
        c_sub = _round_up(channel, 8)
        in_bytes = p_pad * batch * channel * itemsize
        out_bytes = 4 * (p_pad * channel + p_pad * channel * channel)
        vmem_needed = tp * per_patch_bytes + c_sub * c_lane * 4 + (2 << 20)
        vmem_limit = int(min(max(vmem_needed, 32 << 20), int(vmem_cap * 0.90)))

        mean_pc, cov_pcc = pl.pallas_call(
            functools.partial(_gaussian_kernel, n_batch=batch),
            out_shape=(
                jax.ShapeDtypeStruct((p_pad, channel), jnp.float32),
                jax.ShapeDtypeStruct((p_pad, channel, channel), jnp.float32),
            ),
            grid_spec=pltpu.PrefetchScalarGridSpec(
                num_scalar_prefetch=0,
                grid=grid,
                in_specs=[
                    pl.BlockSpec((tp, batch, channel), lambda i: (i, 0, 0)),
                ],
                out_specs=(
                    pl.BlockSpec((tp, channel), lambda i: (i, 0)),
                    pl.BlockSpec((tp, channel, channel), lambda i: (i, 0, 0)),
                ),
            ),
            compiler_params=pltpu.CompilerParams(
                dimension_semantics=("parallel",),
                vmem_limit_bytes=vmem_limit,
            ),
            cost_estimate=pl.CostEstimate(
                flops=2 * p_pad * batch * channel * channel,
                transcendentals=0,
                bytes_accessed=in_bytes + out_bytes,
            ),
        )(emb)

        # Strip patch padding (padded patches carried zeros -> cov = 0.01*I).
        mean = mean_pc[:patch]                               # (P, C)
        cov = cov_pcc[:patch]                                # (P, C, C)

        # Buffer layout matches the PyTorch module: mean is (channel, patch).
        self.mean = mean.T

        # Inverse of the SPD covariance via Cholesky + triangular solve
        # (equivalent to torch.linalg.inv here, cheaper and safer).
        chol = jnp.linalg.cholesky(cov)                      # (P, C, C), lower
        eye_b = jnp.broadcast_to(jnp.eye(channel, dtype=jnp.float32), cov.shape)
        l_inv = lax.linalg.triangular_solve(
            chol, eye_b, left_side=True, lower=True)         # L^{-1}
        self.inv_covariance = jnp.einsum("pki,pkj->pij", l_inv, l_inv)  # L^{-T} L^{-1}
        return [self.mean, self.inv_covariance]

    def fit(self, embedding: jax.Array):
        return self.forward(embedding)


def _reference(embedding):
    """Pure-JAX reference mirroring the PyTorch semantics."""
    emb = embedding.astype(jnp.float32)
    patch, batch, channel = emb.shape
    ev = jnp.transpose(emb, (1, 2, 0))                       # (B, C, P)
    mean = jnp.mean(ev, axis=0)                              # (C, P)
    xm = ev - mean[None]                                     # (B, C, P)
    cov = jnp.einsum("bcp,bdp->pcd", xm, xm) / (batch - 1)
    cov = cov + 0.01 * jnp.eye(channel, dtype=jnp.float32)[None]
    inv_cov = jnp.linalg.inv(cov)
    return mean, inv_cov


if __name__ == "__main__":
    key = jax.random.PRNGKey(0)
    # Small shapes: exercises patch tiling (2 grid steps after 12 -> 16 patch
    # padding) and the unpadded-channel (masked-lane) path (channel = 8).
    patch, batch, channel = 12, 32, 8
    embedding = jax.random.normal(key, (patch, batch, channel), dtype=jnp.float32)

    model = MultiVariateGaussian(n_features=channel, n_patches=patch)
    mean, inv_cov = model.fit(embedding)
    jax.block_until_ready(mean)
    jax.block_until_ready(inv_cov)

    ref_mean, ref_inv_cov = _reference(embedding)
    assert mean.shape == (channel, patch)
    assert inv_cov.shape == (patch, channel, channel)
    assert jnp.allclose(mean, ref_mean, atol=1e-4, rtol=1e-4)
    assert jnp.allclose(inv_cov, ref_inv_cov, atol=1e-3, rtol=1e-3)

    print("KERNEL_OK")
</pallas_src>

<mosaic_0001>
module attributes {stable_mosaic.version = 11 : i64} {
  func.func @_gaussian_kernel(%arg0: i32, %arg1: memref<8x32x8xf32, #tpu.memory_space<vmem>>, %arg2: memref<8x8xf32, #tpu.memory_space<vmem>>, %arg3: memref<8x8x8xf32, #tpu.memory_space<vmem>>) attributes {dimension_semantics = [#tpu.dimension_semantics<parallel>], iteration_bounds = array<i64: 2>, scalar_prefetch = 0 : i64, scratch_operands = 0 : i64, tpu.core_type = #tpu.core_type<tc>, window_params = [{transform_indices = @transform_0, window_bounds = array<i64: 8, 32, 8>}, {transform_indices = @transform_1, window_bounds = array<i64: 8, 8>}, {transform_indices = @transform_2, window_bounds = array<i64: 8, 8, 8>}]} {
    %c0 = arith.constant 0 : index
    %c0_0 = arith.constant 0 : index
    %c0_1 = arith.constant 0 : index
    %0 = vector.load %arg1[%c0, %c0_0, %c0_1] : memref<8x32x8xf32, #tpu.memory_space<vmem>>, vector<8x32x8xf32>
    %cst = arith.constant dense<0.000000e+00> : vector<8x8xf32>
    %1 = vector.multi_reduction <add>, %0, %cst [1] : vector<8x32x8xf32> to vector<8x8xf32>
    %cst_2 = arith.constant 3.125000e-02 : f32
    %2 = vector.broadcast %cst_2 : f32 to vector<8x8xf32>
    %3 = arith.mulf %1, %2 : vector<8x8xf32>
    %c0_3 = arith.constant 0 : index
    %c0_4 = arith.constant 0 : index
    %4 = vector.load %arg2[%c0_3, %c0_4] : memref<8x8xf32, #tpu.memory_space<vmem>>, vector<8x8xf32>
    tpu.vector_store %arg2[%c0_3, %c0_4], %3 {strides = array<i32>} : memref<8x8xf32, #tpu.memory_space<vmem>>, vector<8x8xf32>,
    %5 = vector.shape_cast %3 : vector<8x8xf32> to vector<8x1x8xf32>
    %6 = vector.broadcast %5 : vector<8x1x8xf32> to vector<8x32x8xf32>
    %7 = arith.subf %0, %6 : vector<8x32x8xf32>
    "tpu.trace_start"() <{level = 10 : i32, message = "pbc,pbd->pcd"}> : () -> ()
    %cst_5 = arith.constant dense<0.000000e+00> : vector<8x8x8xf32>
    %8 = tpu.matmul %7, %7, %cst_5 {dimension_numbers = #tpu.dot_dimension_numbers<[1], [1], [2], [2], [0, 0, 0, 2, 1, 2], [0], [0]>} : vector<8x32x8xf32>, vector<8x32x8xf32>, vector<8x8x8xf32> -> vector<8x8x8xf32>
    "tpu.trace_stop"() : () -> ()
    %cst_6 = arith.constant 0.0322580636 : f32
    %9 = vector.broadcast %cst_6 : f32 to vector<8x8x8xf32>
    %10 = arith.mulf %8, %9 : vector<8x8x8xf32>
    %11 = tpu.iota {dimensions = array<i32: 0>} : vector<8x8xi32>
    %12 = tpu.iota {dimensions = array<i32: 1>} : vector<8x8xi32>
    %13 = arith.cmpi eq, %11, %12 : vector<8x8xi32>
    %cst_7 = arith.constant 0.00999999977 : f32
    %cst_8 = arith.constant 0.000000e+00 : f32
    %14 = vector.broadcast %cst_7 : f32 to vector<8x8xf32>
    %15 = vector.broadcast %cst_8 : f32 to vector<8x8xf32>
    %16 = arith.select %13, %14, %15 : vector<8x8xi1>, vector<8x8xf32>
    %17 = vector.shape_cast %16 : vector<8x8xf32> to vector<1x8x8xf32>
    %18 = vector.broadcast %17 : vector<1x8x8xf32> to vector<8x8x8xf32>
    %19 = arith.addf %10, %18 : vector<8x8x8xf32>
    %c0_9 = arith.constant 0 : index
    %c0_10 = arith.constant 0 : index
    %c0_11 = arith.constant 0 : index
    %20 = vector.load %arg3[%c0_9, %c0_10, %c0_11] : memref<8x8x8xf32, #tpu.memory_space<vmem>>, vector<8x8x8xf32>
    tpu.vector_store %arg3[%c0_9, %c0_10, %c0_11], %19 {strides = array<i32>} : memref<8x8x8xf32, #tpu.memory_space<vmem>>, vector<8x8x8xf32>,
    return
  }
  func.func @transform_0(%arg0: i32) -> (i32, i32, i32) {
    %c0_i32 = arith.constant 0 : i32
    %c0_i32_0 = arith.constant 0 : i32
    %c0_i32_1 = arith.constant 0 : i32
    return %arg0, %c0_i32, %c0_i32_0 : i32, i32, i32
  }
  func.func @transform_1(%arg0: i32) -> (i32, i32) {
    %c0_i32 = arith.constant 0 : i32
    %c0_i32_0 = arith.constant 0 : i32
    return %arg0, %c0_i32 : i32, i32
  }
  func.func @transform_2(%arg0: i32) -> (i32, i32, i32) {
    %c0_i32 = arith.constant 0 : i32
    %c0_i32_0 = arith.constant 0 : i32
    %c0_i32_1 = arith.constant 0 : i32
    return %arg0, %c0_i32, %c0_i32_0 : i32, i32, i32
  }
}

</mosaic_0001>

<bundles_post_ra>
// kernel: tpu_custom_call.1
= control target key start
LH: loop header
LB: loop body
LE: loop exit
PB: predicated region body
PF: predicated region fallthrough
CT: control target
= control target key end

     0   :  { %s975_s9 = smov 0   ;;  %s1276_s0 = inlined_call_operand.vmem [shape: f32[16,32,8], index: 0, kind: input, shape index: {}]   ;;  %s1277_s1 = inlined_call_operand.vmem [shape: f32[16,8], index: 1, kind: output, shape index: {0}]   ;;  %s1278_s2 = inlined_call_operand.vmem [shape: f32[16,8,8], index: 2, kind: output, shape index: {1}]  }
   0x1 LB: > { %s981_s10 = sadd.s32 4294967295, %s957_s9   ;;  %p924_p0 = scmp.ge.s32.totalorder %s957_s9, 1  ;;  %s957_s9 = sphi %s975_s9, %s13_s9  }
   0x2   : > { %p117_p1 = scmp.lt.s32.totalorder %s957_s9, 3 }
   0x4   : > { %p118_p2 = pnand %p924_p0, %p117_p1 }
   0x5   : > { %s925_s11 = sshll.u32 (!%p118_p2), %s981_s10, 3  ;;  %p151_p4 = scmp.lt.s32.totalorder (!%p118_p2), %s981_s10, 1 }
   0x6   : > { %121 = sbr.rel (%p118_p2) target bundleno = 399 (0x18f), region = 24  ;;  %p145_p3 = scmp.lt.s32.totalorder (!%p118_p2), %s925_s11, 15 }
   0xb   : > { %s1280_s11 = smov (!%p145_p3, %s925_s11), 15  ;;  %vm193_vm0 = vcmask 64512   ;;  %vm314_vm1 = vcmask 1041409   ;;  %vm316_vm2 = vcmask 1042434   ;;  %s1282_s10 = smov (!%p151_p4, %s981_s10), 1  ;;  %vm318_vm3 = vcmask 1043459  }
   0xc   : > { %s941_s12 = sshll.u32 %s1280_s11, 5  ;;  %s928_s16 = sshll.u32 %s1282_s10, 3  ;;  %vm320_vm4 = vcmask 1044484   ;;  %vm322_vm5 = vcmask 1045509   ;;  %vm324_vm6 = vcmask 1046534   ;;  %vm326_vm7 = vcmask 1047559  }
   0xd   : > { %s992_s15 = scalar_lea.vmem %s1276_s0, %s941_s12  ;;  %s154_s19 = scalar_lea.vmem %s1277_s1, %s928_s16  ;;  %vm394_vm8 = vcmask 261120  }
   0xe   : > { %v995_v0 = vld [vmem:[%s992_s15 + $0x60] sm:$0xff]  ;;  %v998_v1 = vld [vmem:[%s992_s15 + $0x68] sm:$0xff]  ;;  %v1001_v2 = vld [vmem:[%s992_s15 + $0x70] sm:$0xff]  ;;  %s930_s20 = sshll.u32 %s1280_s11, 3 }
   0xf   : > { %v1004_v3 = vld [vmem:[%s992_s15 + $0x78] sm:$0xff]  ;;  %v233_v4 = vsel %vm193_vm0, %v995_v0, 0.0  ;;  %v234_v5 = vsel %vm193_vm0, %v998_v1, 0.0  ;;  %v236_v6 = vsel %vm193_vm0, %v1001_v2, 0.0  ;;  %v1013_v7 = vld [vmem:[%s992_s15 + $0x40] sm:$0xff]  ;;  %v1016_v8 = vld [vmem:[%s992_s15 + $0x48] sm:$0xff]  ;;  %s159_s23 = scalar_lea.vmem %s1278_s2, %s930_s20 }
  0x10   : > { %v235_v9 = vadd.f32 %v234_v5, %v233_v4  ;;  %v1019_v10 = vld [vmem:[%s992_s15 + $0x50] sm:$0xff]  ;;  %v1022_v11 = vld [vmem:[%s992_s15 + $0x58] sm:$0xff]  ;;  %v220_v12 = vsel %vm193_vm0, %v1013_v7, 0.0  ;;  %v221_v13 = vsel %vm193_vm0, %v1016_v8, 0.0  ;;  %v1029_v14 = vld [vmem:[%s992_s15 + $0xc0] sm:$0xff]  ;;  %v238_v15 = vsel %vm193_vm0, %v1004_v3, 0.0 }
  0x11   : > { %v222_v16 = vadd.f32 %v221_v13, %v220_v12  ;;  %v223_v17 = vsel %vm193_vm0, %v1019_v10, 0.0  ;;  %v1036_v18 = vld [vmem:[%s992_s15 + $0xc8] sm:$0xff]  ;;  %v1039_v19 = vld [vmem:[%s992_s15 + $0xd0] sm:$0xff]  ;;  %v272_v20 = vsel %vm193_vm0, %v1029_v14, 0.0  ;;  %v1044_v21 = vld [vmem:[%s992_s15 + $0x20] sm:$0xff]  ;;  %v225_v23 = vsel %vm193_vm0, %v1022_v11, 0.0 }
  0x12   : > { %v237_v22 = vadd.f32 %v236_v6, %v235_v9  ;;  %v273_v24 = vsel %vm193_vm0, %v1036_v18, 0.0  ;;  %v275_v25 = vsel %vm193_vm0, %v1039_v19, 0.0  ;;  %v1053_v26 = vld [vmem:[%s992_s15 + $0x28] sm:$0xff]  ;;  %v1056_v28 = vld [vmem:[%s992_s15 + $0xd8] sm:$0xff]  ;;  %v207_v31 = vsel %vm193_vm0, %v1044_v21, 0.0  ;;  %v1063_v33 = vld [vmem:[%s992_s15] sm:$0xff] }
  0x13   : > { %v224_v27 = vadd.f32 %v223_v17, %v222_v16  ;;  %v274_v29 = vadd.f32 %v273_v24, %v272_v20  ;;  %v208_v32 = vsel %vm193_vm0, %v1053_v26, 0.0  ;;  %v1066_v34 = vld [vmem:[%s992_s15 + $0x8] sm:$0xff]  ;;  %v1069_v37 = vld [vmem:[%s992_s15 + $0x30] sm:$0xff]  ;;  %v194_v38 = vsel %vm193_vm0, %v1063_v33, 0.0  ;;  %v1085_v49 = vld [vmem:[%s992_s15 + $0x18] sm:$0xff] }
  0x14   : > { %v239_v30 = vadd.f32 %v238_v15, %v237_v22  ;;  %v195_v39 = vsel %vm193_vm0, %v1066_v34, 0.0  ;;  %v277_v41 = vsel %vm193_vm0, %v1056_v28, 0.0  ;;  %v1078_v42 = vld [vmem:[%s992_s15 + $0x10] sm:$0xff]  ;;  %v209_v45 = vadd.f32 %v208_v32, %v207_v31  ;;  %v1088_v53 = vld [vmem:[%s992_s15 + $0x38] sm:$0xff] }
  0x15   : > { %v226_v35 = vadd.f32 %v225_v23, %v224_v27  ;;  %v276_v36 = vadd.f32 %v275_v25, %v274_v29  ;;  %v196_v43 = vadd.f32 %v195_v39, %v194_v38  ;;  %v197_v46 = vsel %vm193_vm0, %v1078_v42, 0.0  ;;  %v1128_v39 = vld [vmem:[%s992_s15 + $0xa0] sm:$0xff] }
  0x16   : > { %v240_v40 = vrot.slane %v239_v30, 4  ;;  %v210_v48 = vsel %vm193_vm0, %v1069_v37, 0.0  ;;  %v199_v54 = vsel %vm193_vm0, %v1085_v49, 0.0  ;;  %v212_v60 = vsel %vm193_vm0, %v1088_v53, 0.0 }
  0x17   : > { %v227_v44 = vrot.slane %v226_v35, 4  ;;  %v198_v50 = vadd.f32 %v197_v46, %v196_v43  ;;  %v278_v52 = vadd.f32 %v277_v41, %v276_v36  ;;  %v211_v58 = vadd.f32 %v210_v48, %v209_v45  ;;  %v1134_v41 = vld [vmem:[%s992_s15 + $0x80] sm:$0xff] }
  0x18   : > { %v241_v47 = vadd.f32 %v240_v40, %v239_v30  ;;  %v1131_v40 = vld [vmem:[%s992_s15 + $0xa8] sm:$0xff]  ;;  %v246_v45 = vsel %vm193_vm0, %v1134_v41, 0.0 }
  0x19   : > { %v228_v51 = vadd.f32 %v227_v44, %v226_v35  ;;  %v200_v56 = vadd.f32 %v199_v54, %v198_v50  ;;  %v279_v63 = vrot.slane %v278_v52, 4  ;;  %v213_v9 = vadd.f32 %v212_v60, %v211_v58  ;;  %v1141_v44 = vld [vmem:[%s992_s15 + $0x88] sm:$0xff]  ;;  %v1149_v50 = vld [vmem:[%s992_s15 + $0x90] sm:$0xff]  ;;  %v1162_v58 = vld [vmem:[%s992_s15 + $0xb8] sm:$0xff] }
  0x1a   : > { %v242_v55 = vrot.slane %v241_v47, 2  ;;  %v260_v43 = vsel %vm193_vm0, %v1131_v40, 0.0  ;;  %v1165_v60 = vld [vmem:[%s992_s15 + $0x98] sm:$0xff] }
  0x1b   : > { %v229_v57 = vrot.slane %v228_v51, 2  ;;  %v201_v61 = vrot.slane %v200_v56, 4  ;;  %v280_v16 = vadd.f32 %v279_v63, %v278_v52  ;;  %v214_v23 = vrot.slane %v213_v9, 4  ;;  %v1172_v63 = vld [vmem:[%s992_s15 + $0xe0] sm:$0xff] }
  0x1c   : > { %v243_v59 = vadd.f32 %v242_v55, %v241_v47  ;;  %v1146_v47 = vld [vmem:[%s992_s15 + $0xb0] sm:$0xff] }
  0x1d   : > { %v230_v62 = vadd.f32 %v229_v57, %v228_v51  ;;  %v202_v5 = vadd.f32 %v201_v61, %v200_v56  ;;  %v281_v30 = vrot.slane %v280_v16, 2  ;;  %v247_v51 = vsel %vm193_vm0, %v1141_v44, 0.0 }
  0x1e   : > { %v244_v4 = vrot.slane %v243_v59, 1  ;;  %v262_v54 = vsel %vm193_vm0, %v1146_v47, 0.0  ;;  %v248_v55 = vadd.f32 %v247_v51, %v246_v45  ;;  %v249_v56 = vsel %vm193_vm0, %v1149_v50, 0.0 }
  0x1f   : > { %v231_v6 = vrot.slane %v230_v62, 1  ;;  %v203_v13 = vrot.slane %v202_v5, 2  ;;  %v264_v61 = vsel %vm193_vm0, %v1162_v58, 0.0 }
  0x20   : > { %v245_v12 = vadd.f32 %v244_v4, %v243_v59  ;;  %v1175_v4 = vld [vmem:[%s992_s15 + $0xe8] sm:$0xff] }
  0x21   : > { %v232_v15 = vadd.f32 %v231_v6, %v230_v62  ;;  %v204_v20 = vadd.f32 %v203_v13, %v202_v5  ;;  %v250_v62 = vadd.f32 %v249_v56, %v248_v55 }
  0x22   : > { %v1094_v17 = vmul.f32 0.03125, %v245_v12  ;;  %v286_v12 = vsel %vm193_vm0, %v1175_v4, 0.0 }
  0x23   : > { %v1096_v22 = vmul.f32 0.03125, %v232_v15  ;;  %v205_v32 = vrot.slane %v204_v20, 1  ;;  %v1185_v15 = vld [vmem:[%s992_s15 + $0xf0] sm:$0xff] }
  0x24   : > { %v342_v24 = vsub.f32 %v995_v0, %v1094_v17  ;;  %v1102_v25 = vsub.f32 %v1004_v3, %v1094_v17  ;;  %v344_v31 = vsub.f32 %v1001_v2, %v1094_v17  ;;  %v215_v3 = vadd.f32 %v214_v23, %v213_v9 }
  0x25   : > { %v338_v27 = vsub.f32 %v1013_v7, %v1096_v22  ;;  %v1108_v29 = vsub.f32 %v1022_v11, %v1096_v22  ;;  %v340_v0 = vsub.f32 %v1019_v10, %v1096_v22  ;;  %v343_v7 = vsub.f32 %v998_v1, %v1094_v17 }
  0x26   : > { %528 = vxpose.xlu1.b32.start [1/4] (short) (narrow) %v342_v24, 8  ;;  %575 = vmatpush.msra.mxu3 %v1102_v25  ;;  %v206_v11 = vadd.f32 %v205_v32, %v204_v20  ;;  %v339_v35 = vsub.f32 %v1016_v8, %v1096_v22  ;;  %v282_v2 = vadd.f32 %v281_v30, %v280_v16  ;;  %v216_v10 = vrot.slane %v215_v3, 2  ;;  %v1194_v32 = vld [vmem:[%s992_s15 + $0xf8] sm:$0xff] }
  0x27   : > { %473 = vxpose.xlu0.b32.start [1/4] (short) (narrow) %v338_v27, 8  ;;  %520 = vmatpush.msra.mxu2 %v1108_v29  ;;  %v285_v9 = vsel %vm193_vm0, %v1172_v63, 0.0 }
  0x28   : > { %576 = vmatpush.msra.mxu3 %v344_v31  ;;  %v1120_v36 = vmul.f32 0.03125, %v206_v11  ;;  %v283_v1 = vrot.slane %v282_v2, 1  ;;  %v217_v8 = vadd.f32 %v216_v10, %v215_v3  ;;  %v287_v16 = vadd.f32 %v286_v12, %v285_v9 }
  0x29   : > { %521 = vmatpush.msra.mxu2 %v340_v0 }
  0x2a   : > { %577 = vmatpush.msra.mxu3 %v343_v7  ;;  %v1124_v38 = vsub.f32 %v1063_v33, %v1120_v36  ;;  %v259_v33 = vsel %vm193_vm0, %v1128_v39, 0.0  ;;  %v284_v46 = vadd.f32 %v283_v1, %v282_v2  ;;  %v1155_v52 = vsub.f32 %v1066_v34, %v1120_v36 }
  0x2b   : > { %522 = vmatpush.msra.mxu2 %v339_v35  ;;  %v261_v48 = vadd.f32 %v260_v43, %v259_v33  ;;  %v218_v57 = vrot.slane %v217_v8, 1  ;;  %v251_v34 = vsel %vm193_vm0, %v1165_v60, 0.0 }
  0x2c   : > { %578 = vmatpush.msra.mxu3 %v342_v24  ;;  %362 = vxpose.xlu2.b32.start [1/4] (short) (narrow) %v1124_v38, 8  ;;  %v1177_v5 = vmul.f32 0.03125, %v284_v46  ;;  %v252_v13 = vadd.f32 %v251_v34, %v250_v62 }
  0x2d   : > { %523 = vmatpush.msra.mxu2 %v338_v27  ;;  %v263_v59 = vadd.f32 %v262_v54, %v261_v48  ;;  %v219_v20 = vadd.f32 %v218_v57, %v217_v8  ;;  %v288_v27 = vsel %vm193_vm0, %v1185_v15, 0.0 }
  0x2e   : > { %529 = vxpose.xlu1.b32.cont [2/4] (short) (narrow) %v343_v7, 8  ;;  %v1189_v23 = vsub.f32 %v1056_v28, %v1177_v5  ;;  %v253_v30 = vrot.slane %v252_v13, 4  ;;  %v1198_v3 = vsub.f32 %v1039_v19, %v1177_v5  ;;  %v332_v28 = vsub.f32 %v1078_v42, %v1120_v36 }
  0x2f   : > { %474 = vxpose.xlu0.b32.cont [2/4] (short) (narrow) %v339_v35, 8  ;;  %v265_v6 = vadd.f32 %v264_v61, %v263_v59  ;;  %v299_v2 = vmul.f32 0.03125, %v219_v20  ;;  %v355_v10 = vsub.f32 %v1036_v18, %v1177_v5  ;;  %v354_v42 = vsub.f32 %v1029_v14, %v1177_v5 }
  0x30   : > { %740 = vmatpush.msrb.mxu2 %v1189_v23  ;;  %v254_v11 = vadd.f32 %v253_v30, %v252_v13 }
  0x31   : > { %v266_v24 = vrot.slane %v265_v6, 4  ;;  %v1209_v33 = vsub.f32 %v1088_v53, %v299_v2  ;;  %v336_v46 = vsub.f32 %v1069_v37, %v299_v2  ;;  %v333_v53 = vsub.f32 %v1085_v49, %v1120_v36 }
  0x32   : > { %741 = vmatpush.msrb.mxu2 %v1198_v3  ;;  %v255_v19 = vrot.slane %v254_v11, 2  ;;  %v315_v14 = vsel %vm314_vm1, %v299_v2, %v1120_v36  ;;  %v335_v54 = vsub.f32 %v1053_v26, %v299_v2  ;;  %v334_v49 = vsub.f32 %v1044_v21, %v299_v2 }
  0x33   : > { %v267_v7 = vadd.f32 %v266_v24, %v265_v6  ;;  %465 = vmatpush.msra.mxu1 %v1209_v33  ;;  %410 = vmatpush.msra.mxu0 %v333_v53  ;;  %v317_v56 = vsel %vm316_vm2, %v1096_v22, %v315_v14 }
  0x34   : > { %363 = vxpose.xlu2.b32.cont [2/4] (short) (narrow) %v1155_v52, 8  ;;  %742 = vmatpush.msrb.mxu2 %v355_v10  ;;  %v256_v18 = vadd.f32 %v255_v19, %v254_v11  ;;  %v319_v21 = vsel %vm318_vm3, %v1094_v17, %v317_v56 }
  0x35   : > { %v268_v1 = vrot.slane %v267_v7, 2  ;;  %466 = vmatpush.msra.mxu1 %v336_v46  ;;  %411 = vmatpush.msra.mxu0 %v332_v28 }
  0x36   : > { %530 = vxpose.xlu1.b32.cont [3/4] (short) (narrow) %v344_v31, 8  ;;  %v289_v31 = vadd.f32 %v288_v27, %v287_v16  ;;  %743 = vmatpush.msrb.mxu2 %v354_v42 }
  0x37   : > { %475 = vxpose.xlu0.b32.cont [3/4] (short) (narrow) %v340_v0, 8  ;;  %v290_v0 = vsel %vm193_vm0, %v1194_v32, 0.0  ;;  %v269_v43 = vadd.f32 %v268_v1, %v267_v7  ;;  %467 = vmatpush.msra.mxu1 %v335_v54 }
  0x38   : > { %v291_v35 = vadd.f32 %v290_v0, %v289_v31  ;;  %412 = vmatpush.msra.mxu0 %v1155_v52 }
  0x39   : > { %v270_v48 = vrot.slane %v269_v43, 1  ;;  %468 = vmatpush.msra.mxu1 %v334_v49 }
  0x3a   : > { %v292_v8 = vrot.slane %v291_v35, 4  ;;  %413 = vmatpush.msra.mxu0 %v1124_v38 }
  0x3b   : > { %v271_v55 = vadd.f32 %v270_v48, %v269_v43 }
  0x3c   : > { %364 = vxpose.xlu2.b32.cont [3/4] (short) (narrow) %v332_v28, 8  ;;  %v293_v45 = vadd.f32 %v292_v8, %v291_v35 }
  0x3d   : > { %v303_v36 = vmul.f32 0.03125, %v271_v55 }
  0x3e   : > { %531 = vxpose.xlu1.b32.end [4/4] (short) (narrow) %v1102_v25, 8  ;;  %v257_v25 = vrot.slane %v256_v18, 1  ;;  %v294_v51 = vrot.slane %v293_v45, 2 }
  0x3f   : > { %476 = vxpose.xlu0.b32.end [4/4] (short) (narrow) %v1108_v29, 8  ;;  %v353_v38 = vsub.f32 %v1162_v58, %v303_v36  ;;  %v352_v9 = vsub.f32 %v1146_v47, %v303_v36 }
  0x40   : > { %v258_v37 = vadd.f32 %v257_v25, %v256_v18  ;;  %v295_v29 = vadd.f32 %v294_v51, %v293_v45 }
  0x41   : > { %685 = vmatpush.msrb.mxu1 %v353_v38 }
  0x42   : > { %v296_v57 = vrot.slane %v295_v29, 1  ;;  %v302_v26 = vmul.f32 0.03125, %v258_v37 }
  0x43   : > { %686 = vmatpush.msrb.mxu1 %v352_v9 }
  0x44   : > { %365 = vxpose.xlu2.b32.end [4/4] (short) (narrow) %v333_v53, 8  ;;  %v297_v59 = vadd.f32 %v296_v57, %v295_v29  ;;  %v321_v22 = vsel %vm320_vm4, %v302_v26, %v319_v21  ;;  %v349_v12 = vsub.f32 %v1165_v60, %v302_v26  ;;  %v348_v58 = vsub.f32 %v1149_v50, %v302_v26 }
  0x45   : > { %v323_v61 = vsel %vm322_vm5, %v303_v36, %v321_v22  ;;  %v347_v13 = vsub.f32 %v1141_v44, %v302_v26 }
  0x46   : > { %693 = vxpose.xlu1.b32.start [1/4] (short) (narrow) %v354_v42, 8  ;;  %v305_v52 = vmul.f32 0.03125, %v297_v59  ;;  %v325_v62 = vsel %vm324_vm6, %v1177_v5, %v323_v61  ;;  %630 = vmatpush.msrb.mxu0 %v349_v12 }
  0x47   : > { %418 = vxpose.xlu0.b32.start [1/4] (short) (narrow) %v334_v49, 8 }
  0x48   : > { %v358_v34 = vsub.f32 %v1172_v63, %v305_v52  ;;  %v327_v6 = vsel %vm326_vm7, %v305_v52, %v325_v62  ;;  %v359_v17 = vsub.f32 %v1175_v4, %v305_v52  ;;  %v360_v5 = vsub.f32 %v1185_v15, %v305_v52  ;;  %631 = vmatpush.msrb.mxu0 %v348_v58 }
  0x49   : > { %329 = vst.msk [vmem:[%s154_s19] sm:$0xff] %vm193_vm0, %v327_v6  ;;  %v351_v63 = vsub.f32 %v1131_v40, %v303_v36  ;;  %v350_v4 = vsub.f32 %v1128_v39, %v303_v36  ;;  %v361_v47 = vsub.f32 %v1194_v32, %v305_v52  ;;  %v346_v40 = vsub.f32 %v1134_v41, %v302_v26 }
  0x4a   : > { %632 = vmatpush.msrb.mxu0 %v347_v13  ;;  %v959_v32 = vmov 0.0  }
  0x4b   : > { %687 = vmatpush.msrb.mxu1 %v351_v63  ;;  %795 = vmatpush.msrb.mxu3 %v361_v47 }
  0x4c   : > { %748 = vxpose.xlu2.b32.start [1/4] (short) (narrow) %v358_v34, 8  ;;  %633 = vmatpush.msrb.mxu0 %v346_v40 }
  0x4d   : > { %688 = vmatpush.msrb.mxu1 %v350_v4  ;;  %796 = vmatpush.msrb.mxu3 %v360_v5 }
  0x4e   : > { %694 = vxpose.xlu1.b32.cont [2/4] (short) (narrow) %v355_v10, 8 }
  0x4f   : > { %419 = vxpose.xlu0.b32.cont [2/4] (short) (narrow) %v335_v54, 8  ;;  %797 = vmatpush.msrb.mxu3 %v359_v17 }
  0x51   : > { %798 = vmatpush.msrb.mxu3 %v358_v34 }
  0x54   : > { %749 = vxpose.xlu2.b32.cont [2/4] (short) (narrow) %v359_v17, 8 }
  0x56   : > { %695 = vxpose.xlu1.b32.cont [3/4] (short) (narrow) %v1198_v3, 8 }
  0x57   : > { %420 = vxpose.xlu0.b32.cont [3/4] (short) (narrow) %v336_v46, 8 }
  0x5c   : > { %750 = vxpose.xlu2.b32.cont [3/4] (short) (narrow) %v360_v5, 8 }
  0x5e   : > { %696 = vxpose.xlu1.b32.end [4/4] (short) (narrow) %v1189_v23, 8  ;;  %v811_v23 = vlaneseq }
  0x5f   : > { %421 = vxpose.xlu0.b32.end [4/4] (short) (narrow) %v1209_v33, 8 }
  0x60   : > { %v812_v24 = vshrl.u32 %v811_v23, 7  ;;  %v814_v27 = vand.u32 127, %v811_v23 }
  0x62   : > { %vm815_vm9 = vcmp.eq.s32.totalorder %v812_v24, %v814_v27 }
  0x63   : > { %v816_v31 = vsel %vm815_vm9, 0.01, %v959_v32 }
  0x64   : > { %751 = vxpose.xlu2.b32.end [4/4] (short) (narrow) %v361_v47, 8 }
  0x66   : > { %638 = vxpose.xlu1.b32.start [1/4] (short) (narrow) %v350_v4, 8 }
  0x67   : > { %583 = vxpose.xlu0.b32.start [1/4] (short) (narrow) %v346_v40, 8 }
  0x6e   : > { %639 = vxpose.xlu1.b32.cont [2/4] (short) (narrow) %v351_v63, 8 }
  0x6f   : > { %584 = vxpose.xlu0.b32.cont [2/4] (short) (narrow) %v347_v13, 8 }
  0x76   : > { %640 = vxpose.xlu1.b32.cont [3/4] (short) (narrow) %v352_v9, 8 }
  0x77   : > { %585 = vxpose.xlu0.b32.cont [3/4] (short) (narrow) %v348_v58, 8 }
  0x7e   : > { %641 = vxpose.xlu1.b32.end [4/4] (short) (narrow) %v353_v38, 8 }
  0x7f   : > { %586 = vxpose.xlu0.b32.end [4/4] (short) (narrow) %v349_v12, 8 }
  0xc5   : > { %v378_v39 = vpop.trf.xlu2 }
  0xc6   : > { %931 = vmatmul.msk.f32.vlgmr.msra.gmra.mxu0 %vm394_vm8, %v378_v39 }
  0xca   : > { %v544_v44 = vpop.trf.xlu1 }
  0xcb   : > { %v489_v41 = vpop.trf.xlu0  ;;  %934 = vmatmul.msk.f32.vlgmr.msra.gmra.mxu3 %vm394_vm8, %v544_v44 }
  0xcc   : > { %933 = vmatmul.msk.f32.vlgmr.msra.gmra.mxu2 %vm394_vm8, %v489_v41 }
  0xe5   : > { %v764_v50 = vpop.trf.xlu2 }
  0xe6   : > { %938 = vmatmul.msk.f32.vlgmr.msrb.gmra.mxu3 %vm394_vm8, %v764_v50 }
  0xea   : > { %v709_v60 = vpop.trf.xlu1 }
  0xeb   : > { %v434_v15 = vpop.trf.xlu0  ;;  %937 = vmatmul.msk.f32.vlgmr.msrb.gmra.mxu2 %vm394_vm8, %v709_v60 }
  0xec   : > { %932 = vmatmul.msk.f32.vlgmr.msra.gmra.mxu1 %vm394_vm8, %v434_v15 }
 0x10a   : > { %v654_v16 = vpop.trf.xlu1 }
 0x10b   : > { %v599_v20 = vpop.trf.xlu0  ;;  %936 = vmatmul.msk.f32.vlgmr.msrb.gmra.mxu1 %vm394_vm8, %v654_v16 }
 0x10c   : > { %935 = vmatmul.msk.f32.vlgmr.msrb.gmra.mxu0 %vm394_vm8, %v599_v20 }
 0x143   : > { %v415_v30 = vpop.f32.mrf.mxu0 }
 0x144   : > { %v803_v3 = vmul.f32 0.032258064, %v415_v30 }
 0x146   : > { %v817_v7 = vadd.f32 %v816_v31, %v803_v3 }
 0x148   : > { %825 = vst.msk [vmem:[%s159_s23] sm:$0xff] %vm193_vm0, %v817_v7 }
 0x14e   : > { %v580_v0 = vpop.f32.mrf.mxu3 }
 0x14f   : > { %v525_v28 = vpop.f32.mrf.mxu2  ;;  %v806_v11 = vmul.f32 0.032258064, %v580_v0 }
 0x150   : > { %v805_v35 = vmul.f32 0.032258064, %v525_v28 }
 0x151   : > { %v820_v2 = vadd.f32 %v816_v31, %v806_v11 }
 0x152   : > { %v819_v10 = vadd.f32 %v816_v31, %v805_v35 }
 0x153   : > { %828 = vst.msk [vmem:[%s159_s23 + $0x18] sm:$0xff] %vm193_vm0, %v820_v2 }
 0x154   : > { %827 = vst.msk [vmem:[%s159_s23 + $0x10] sm:$0xff] %vm193_vm0, %v819_v10 }
 0x169   : > { %v470_v1 = vpop.f32.mrf.mxu1  ;;  %v800_v8 = vpop.f32.mrf.mxu3 }
 0x16a   : > { %v804_v19 = vmul.f32 0.032258064, %v470_v1  ;;  %v810_v43 = vmul.f32 0.032258064, %v800_v8 }
 0x16c   : > { %v818_v33 = vadd.f32 %v816_v31, %v804_v19  ;;  %v824_v18 = vadd.f32 %v816_v31, %v810_v43 }
 0x16e   : > { %826 = vst.msk [vmem:[%s159_s23 + $0x8] sm:$0xff] %vm193_vm0, %v818_v33  ;;  %v745_v42 = vpop.f32.mrf.mxu2 }
 0x16f   : > { %v809_v45 = vmul.f32 0.032258064, %v745_v42  ;;  %832 = vst.msk [vmem:[%s159_s23 + $0x38] sm:$0xff] %vm193_vm0, %v824_v18 }
 0x171   : > { %v823_v46 = vadd.f32 %v816_v31, %v809_v45 }
 0x173   : > { %831 = vst.msk [vmem:[%s159_s23 + $0x30] sm:$0xff] %vm193_vm0, %v823_v46 }
 0x188   : > { %v690_v53 = vpop.f32.mrf.mxu1 }
 0x189   : > { %v635_v48 = vpop.f32.mrf.mxu0  ;;  %v808_v25 = vmul.f32 0.032258064, %v690_v53 }
 0x18a   : > { %v807_v51 = vmul.f32 0.032258064, %v635_v48 }
 0x18b   : > { %v822_v14 = vadd.f32 %v816_v31, %v808_v25 }
 0x18c   : > { %v821_v54 = vadd.f32 %v816_v31, %v807_v51 }
 0x18d   : > { %830 = vst.msk [vmem:[%s159_s23 + $0x28] sm:$0xff] %vm193_vm0, %v822_v14 }
 0x18e   : > { %829 = vst.msk [vmem:[%s159_s23 + $0x20] sm:$0xff] %vm193_vm0, %v821_v54 }
 0x18f PF: > { %s13_s9 = sadd.s32 1, %s957_s9  }
 0x190   : > { %p10_p5 = scmp.ge.s32.totalorder %s13_s9, 4  }
 0x192   :  { %12 = sbr.rel (!%p10_p5) target bundleno = 1 (0x1), region = 66 }

</bundles_post_ra>
